<compile_context>
chip_gen: v7x
topology: tpu7x:2x2x1
jax: 0.10.0
libtpu: 0.0.40
codegen_flags: <defaults>
</compile_context>

<pallas_src>
import numpy as np
import jax
import jax.numpy as jnp
from jax import lax
from jax.experimental import pallas as pl
from jax.experimental.pallas import tpu as pltpu


def _round_up(n, m):
    return ((n + m - 1) // m) * m


# ----------------------------------------------------------------------------
# Kernel: one batch block (TB rows, batch in lanes) -> sigmoid logits (1, TB)
# ----------------------------------------------------------------------------
def _deepfm_kernel(idx_ref, embT_ref, lin_ref, linb_ref, w1T_ref, b1_ref,
                   w2T_ref, b2_ref, w3_ref, b3_ref, out_ref):
    F, TB = idx_ref.shape
    Tp = embT_ref.shape[1]                                   # padded vocab size

    # ---- fused gather: multi-hot (Tp, TB), one 1 per field per column ------
    idxs = idx_ref[...]                                      # (F, TB) int32 (global ids)
    row_ids = lax.broadcasted_iota(jnp.int32, (Tp, TB), 0)   # vocab id per sublane
    mh = (row_ids == idxs[0][None, :]).astype(jnp.float32)
    for f in range(1, F):                                    # static, F is small
        mh = mh + (row_ids == idxs[f][None, :]).astype(jnp.float32)

    # exT[d, b] = flattened per-field embedding (transposed, D zero-padded).
    exT = jnp.dot(embT_ref[...], mh, preferred_element_type=jnp.float32)  # (Dp, TB)

    # ---- wide part 1: FeaturesLinear ---------------------------------------
    wide1 = jnp.sum(mh * lin_ref[...], axis=0, keepdims=True) + linb_ref[...]

    # ---- wide part 2: FactorizationMachine (reduce_sum=False) on (B, F*E) --
    s = jnp.sum(exT, axis=0, keepdims=True)                  # (1, TB)
    sq = jnp.sum(exT * exT, axis=0, keepdims=True)           # (1, TB)
    wide2 = 0.5 * (s * s - sq)                               # (1, TB)

    # ---- deep part: MLP (BN folded into weights, dropout = eval identity) --
    h = jnp.dot(w1T_ref[...], exT, preferred_element_type=jnp.float32) + b1_ref[...]
    h = jnp.maximum(h, 0.0)
    h = jnp.dot(w2T_ref[...], h, preferred_element_type=jnp.float32) + b2_ref[...]
    h = jnp.maximum(h, 0.0)
    # final (H2 -> 1) projection on the VPU + sublane reduce (no 1-row matmul)
    deep = jnp.sum(h * w3_ref[...], axis=0, keepdims=True) + b3_ref[...]   # (1, TB)

    logits = wide1 + wide2 + deep                            # (1, TB), lane-dense
    out_ref[...] = 1.0 / (1.0 + jnp.exp(-logits))


# ----------------------------------------------------------------------------
# Wrapper
# ----------------------------------------------------------------------------
def deepfm_forward(x, kp, *, tb=1024):
    """x: int (B, F) per-field feature indices. Returns f32 (B,)."""
    B, F = x.shape
    Dp, Tp = kp["embT"].shape
    H1 = kp["w1T"].shape[0]
    H2 = kp["w2T"].shape[0]

    # glue: add per-field offsets (tiny int32 work stays in XLA)
    idx = x.astype(jnp.int32) + kp["offsets"][None, :]            # (B, F)

    # batch tile: lane-dense multiple of 128; keep >=2 grid blocks when the
    # batch allows it so v7x's 2 TensorCores both get work.
    tb = max(128, (int(tb) // 128) * 128)
    half = _round_up(max(1, (B + 1) // 2), 128)
    tb = min(tb, half)
    Bp = _round_up(B, tb)
    if Bp != B:                                   # pad only the tiny id array
        idx = jnp.pad(idx, ((0, Bp - B), (0, 0)))
    idxT = idx.T                                  # (F, Bp): batch in lanes
    grid = (Bp // tb,)

    out = pl.pallas_call(
        _deepfm_kernel,
        out_shape=jax.ShapeDtypeStruct((1, Bp), jnp.float32),
        grid=grid,
        in_specs=[
            pl.BlockSpec((F, tb), lambda i: (0, i)),     # ids      (streamed, lane-dense)
            pl.BlockSpec((Dp, Tp), lambda i: (0, 0)),    # embT     (resident, block-diag)
            pl.BlockSpec((Tp, 1), lambda i: (0, 0)),     # linear weights (resident)
            pl.BlockSpec((1, 1), lambda i: (0, 0)),      # linear bias
            pl.BlockSpec((H1, Dp), lambda i: (0, 0)),    # w1^T (BN folded, D padded)
            pl.BlockSpec((H1, 1), lambda i: (0, 0)),     # b1   (BN folded)
            pl.BlockSpec((H2, H1), lambda i: (0, 0)),    # w2^T (BN folded)
            pl.BlockSpec((H2, 1), lambda i: (0, 0)),     # b2   (BN folded)
            pl.BlockSpec((H2, 1), lambda i: (0, 0)),     # w3 column
            pl.BlockSpec((1, 1), lambda i: (0, 0)),      # b3
        ],
        out_specs=pl.BlockSpec((1, tb), lambda i: (0, i)),   # lane-dense output
        compiler_params=pltpu.CompilerParams(
            dimension_semantics=("parallel",),
            # above the 16/32 MiB scoped defaults, below v7x's 64 MiB physical;
            # actual usage at tb=1024, Dp=Tp=128 is well under 8 MiB.
            vmem_limit_bytes=48 * 1024 * 1024),
    )(idxT, kp["embT"], kp["lin_col"], kp["lin_bias"], kp["w1T"], kp["b1"],
      kp["w2T"], kp["b2"], kp["w3_col"], kp["b3"])
    return out[0, :B]                                           # (B,) == squeeze(1)


# ----------------------------------------------------------------------------
# Parameters (raw module params -> folded inference params)
# ----------------------------------------------------------------------------
def init_raw_params(key, field_dims, embed_dim, mlp_dims):
    assert len(mlp_dims) == 2, "kernel is written for two hidden MLP layers"
    F = len(field_dims)
    D = F * embed_dim
    total = int(sum(field_dims))
    ks = jax.random.split(key, 16)

    raw = {
        "embed_table": 0.1 * jax.random.normal(ks[0], (total, embed_dim), jnp.float32),
        "lin_table": 0.1 * jax.random.normal(ks[1], (total, 1), jnp.float32),
        "lin_bias": 0.01 * jax.random.normal(ks[2], (1,), jnp.float32),
    }
    dims = [D, mlp_dims[0], mlp_dims[1], 1]
    for i in range(3):
        fi, fo = dims[i], dims[i + 1]
        raw[f"w{i+1}"] = (jax.random.normal(ks[3 + i], (fi, fo))
                          / np.sqrt(fi)).astype(jnp.float32)
        raw[f"b{i+1}"] = 0.01 * jax.random.normal(ks[6 + i], (fo,), jnp.float32)
        if i < 2:
            # BatchNorm1d params + running stats (eval mode), non-trivial values
            raw[f"bn{i+1}_gamma"] = 1.0 + 0.1 * jax.random.normal(ks[9 + i], (fo,), jnp.float32)
            raw[f"bn{i+1}_beta"] = 0.1 * jax.random.normal(ks[11 + i], (fo,), jnp.float32)
            raw[f"bn{i+1}_mean"] = 0.05 * jax.random.normal(ks[13 + i], (fo,), jnp.float32)
            raw[f"bn{i+1}_var"] = jax.random.uniform(ks[15], (fo,), jnp.float32, 0.5, 1.5)
    return raw


def fold_for_inference(raw, field_dims, embed_dim, eps=1e-5):
    """BN -> Linear folding + layout prep (transposed, lane-padded, f32)."""
    F = len(field_dims)
    E = embed_dim
    D = F * E
    total = int(sum(field_dims))
    Dp = _round_up(D, 128)
    Tp = _round_up(total, 128)
    offsets = np.concatenate([[0], np.cumsum(field_dims)[:-1]]).astype(np.int32)

    # block-diagonal, transposed embedding: column g holds field(g)'s embedding
    # vector in rows [f*E, (f+1)*E), zeros elsewhere  ->  embT @ multi_hot == ex^T
    tab = np.asarray(raw["embed_table"], np.float32)
    embT = np.zeros((Dp, Tp), np.float32)
    for f, (off, n) in enumerate(zip(offsets, field_dims)):
        embT[f * E:(f + 1) * E, off:off + n] = tab[off:off + n].T
    lin_col = np.zeros((Tp, 1), np.float32)
    lin_col[:total, 0] = np.asarray(raw["lin_table"], np.float32)[:, 0]
    assert embT.nbytes <= 8 * 1024 * 1024, \
        "TODO(synk): vocab too large for a VMEM-resident table; use a DMA gather"

    kp = {
        "offsets": jnp.asarray(offsets),
        "embT": jnp.asarray(embT),
        "lin_col": jnp.asarray(lin_col),
        "lin_bias": jnp.asarray(np.asarray(raw["lin_bias"], np.float32).reshape(1, 1)),
    }
    for i in (1, 2):
        scale = (np.asarray(raw[f"bn{i}_gamma"], np.float32)
                 / np.sqrt(np.asarray(raw[f"bn{i}_var"], np.float32) + eps))
        shift = (np.asarray(raw[f"bn{i}_beta"], np.float32)
                 - np.asarray(raw[f"bn{i}_mean"], np.float32) * scale)
        w = np.asarray(raw[f"w{i}"], np.float32) * scale[None, :]      # (in, out)
        b = np.asarray(raw[f"b{i}"], np.float32) * scale + shift        # (out,)
        wT = np.ascontiguousarray(w.T)                                  # (out, in)
        if i == 1 and Dp != D:
            wT = np.pad(wT, ((0, 0), (0, Dp - D)))                      # zero-pad K dim
        kp[f"w{i}T"] = jnp.asarray(wT)
        kp[f"b{i}"] = jnp.asarray(b[:, None])
    kp["w3_col"] = jnp.asarray(np.asarray(raw["w3"], np.float32))       # (H2, 1)
    kp["b3"] = jnp.asarray(np.asarray(raw["b3"], np.float32).reshape(1, 1))
    return kp


# ----------------------------------------------------------------------------
# Pure-JAX reference: original (unfolded) module math, eval mode, f32
# ----------------------------------------------------------------------------
def deepfm_reference(x, raw, field_dims, eps=1e-5):
    offsets = jnp.asarray(
        np.concatenate([[0], np.cumsum(field_dims)[:-1]]), jnp.int32)
    idx = x.astype(jnp.int32) + offsets[None, :]
    B = x.shape[0]
    ex = raw["embed_table"][idx].reshape(B, -1)                       # (B, F*E)
    wide1 = (jnp.sum(raw["lin_table"][idx][..., 0], axis=1, keepdims=True)
             + raw["lin_bias"][None, :])                              # (B, 1)
    s = jnp.sum(ex, axis=1, keepdims=True)
    wide2 = 0.5 * (s * s - jnp.sum(ex * ex, axis=1, keepdims=True))   # (B, 1)

    def bn(h, g, b, m, v):
        return (h - m) / jnp.sqrt(v + eps) * g + b

    hp = lax.Precision.HIGHEST
    h = jnp.dot(ex, raw["w1"], precision=hp) + raw["b1"]
    h = jnp.maximum(bn(h, raw["bn1_gamma"], raw["bn1_beta"],
                       raw["bn1_mean"], raw["bn1_var"]), 0.0)
    h = jnp.dot(h, raw["w2"], precision=hp) + raw["b2"]
    h = jnp.maximum(bn(h, raw["bn2_gamma"], raw["bn2_beta"],
                       raw["bn2_mean"], raw["bn2_var"]), 0.0)
    deep = jnp.dot(h, raw["w3"], precision=hp) + raw["b3"]            # (B, 1)
    logits = wide1 + wide2 + deep
    return (1.0 / (1.0 + jnp.exp(-logits)))[:, 0]


# ----------------------------------------------------------------------------
if __name__ == "__main__":
    field_dims = [10, 20, 30, 40]        # F = 4 fields, vocab = 100
    embed_dim = 16                       # E  -> D = 64 (padded to 128 in-kernel)
    mlp_dims = (32, 16)                  # two hidden layers
    B = 256                              # batch (2 grid blocks at tb=128)

    key = jax.random.PRNGKey(0)
    kparam, kx = jax.random.split(key)
    raw = init_raw_params(kparam, field_dims, embed_dim, mlp_dims)
    kp = fold_for_inference(raw, field_dims, embed_dim)

    maxes = jnp.asarray(field_dims, jnp.int32)
    x = (jax.random.randint(kx, (B, len(field_dims)), 0, 10_000, dtype=jnp.int32)
         % maxes[None, :])               # valid per-field indices, int32 (B, F)

    out = jax.block_until_ready(deepfm_forward(x, kp))
    ref = deepfm_reference(x, raw, field_dims)

    assert out.shape == (B,) and out.dtype == jnp.float32
    np.testing.assert_allclose(np.asarray(out), np.asarray(ref),
                               rtol=2e-3, atol=2e-3)
    print("KERNEL_OK")
</pallas_src>

<mosaic_0001>
module attributes {stable_mosaic.version = 11 : i64} {
  func.func @_deepfm_kernel(%arg0: i32, %arg1: memref<4x128xi32, #tpu.memory_space<vmem>>, %arg2: memref<128x128xf32, #tpu.memory_space<vmem>>, %arg3: memref<128x1xf32, #tpu.memory_space<vmem>>, %arg4: memref<1x1xf32, #tpu.memory_space<vmem>>, %arg5: memref<32x128xf32, #tpu.memory_space<vmem>>, %arg6: memref<32x1xf32, #tpu.memory_space<vmem>>, %arg7: memref<16x32xf32, #tpu.memory_space<vmem>>, %arg8: memref<16x1xf32, #tpu.memory_space<vmem>>, %arg9: memref<16x1xf32, #tpu.memory_space<vmem>>, %arg10: memref<1x1xf32, #tpu.memory_space<vmem>>, %arg11: memref<1x128xf32, #tpu.memory_space<vmem>>) attributes {dimension_semantics = [#tpu.dimension_semantics<parallel>], iteration_bounds = array<i64: 2>, scalar_prefetch = 0 : i64, scratch_operands = 0 : i64, tpu.core_type = #tpu.core_type<tc>, window_params = [{transform_indices = @transform_0, window_bounds = array<i64: 4, 128>}, {pipeline_mode = #tpu.pipeline_mode<synchronous>, transform_indices = @transform_1, window_bounds = array<i64: 128, 128>}, {pipeline_mode = #tpu.pipeline_mode<synchronous>, transform_indices = @transform_2, window_bounds = array<i64: 128, 1>}, {pipeline_mode = #tpu.pipeline_mode<synchronous>, transform_indices = @transform_3, window_bounds = array<i64: 1, 1>}, {pipeline_mode = #tpu.pipeline_mode<synchronous>, transform_indices = @transform_4, window_bounds = array<i64: 32, 128>}, {pipeline_mode = #tpu.pipeline_mode<synchronous>, transform_indices = @transform_5, window_bounds = array<i64: 32, 1>}, {pipeline_mode = #tpu.pipeline_mode<synchronous>, transform_indices = @transform_6, window_bounds = array<i64: 16, 32>}, {pipeline_mode = #tpu.pipeline_mode<synchronous>, transform_indices = @transform_7, window_bounds = array<i64: 16, 1>}, {pipeline_mode = #tpu.pipeline_mode<synchronous>, transform_indices = @transform_8, window_bounds = array<i64: 16, 1>}, {pipeline_mode = #tpu.pipeline_mode<synchronous>, transform_indices = @transform_9, window_bounds = array<i64: 1, 1>}, {transform_indices = @transform_10, window_bounds = array<i64: 1, 128>}]} {
    %c0 = arith.constant 0 : index
    %c0_0 = arith.constant 0 : index
    %0 = vector.load %arg1[%c0, %c0_0] : memref<4x128xi32, #tpu.memory_space<vmem>>, vector<4x128xi32>
    %1 = tpu.iota {dimensions = array<i32: 0>} : vector<128x128xi32>
    %2 = vector.extract_strided_slice %0 {offsets = [0, 0], sizes = [1, 128], strides = [1, 1]} : vector<4x128xi32> to vector<1x128xi32>
    %3 = vector.shape_cast %2 : vector<1x128xi32> to vector<128xi32>
    %4 = vector.shape_cast %3 : vector<128xi32> to vector<1x128xi32>
    %5 = vector.broadcast %4 : vector<1x128xi32> to vector<128x128xi32>
    %6 = arith.cmpi eq, %1, %5 : vector<128x128xi32>
    %7 = arith.extui %6 : vector<128x128xi1> to vector<128x128xi32>
    %8 = arith.sitofp %7 : vector<128x128xi32> to vector<128x128xf32>
    %9 = vector.extract_strided_slice %0 {offsets = [1, 0], sizes = [1, 128], strides = [1, 1]} : vector<4x128xi32> to vector<1x128xi32>
    %10 = vector.shape_cast %9 : vector<1x128xi32> to vector<128xi32>
    %11 = vector.shape_cast %10 : vector<128xi32> to vector<1x128xi32>
    %12 = vector.broadcast %11 : vector<1x128xi32> to vector<128x128xi32>
    %13 = arith.cmpi eq, %1, %12 : vector<128x128xi32>
    %14 = arith.extui %13 : vector<128x128xi1> to vector<128x128xi32>
    %15 = arith.sitofp %14 : vector<128x128xi32> to vector<128x128xf32>
    %16 = arith.addf %8, %15 : vector<128x128xf32>
    %17 = vector.extract_strided_slice %0 {offsets = [2, 0], sizes = [1, 128], strides = [1, 1]} : vector<4x128xi32> to vector<1x128xi32>
    %18 = vector.shape_cast %17 : vector<1x128xi32> to vector<128xi32>
    %19 = vector.shape_cast %18 : vector<128xi32> to vector<1x128xi32>
    %20 = vector.broadcast %19 : vector<1x128xi32> to vector<128x128xi32>
    %21 = arith.cmpi eq, %1, %20 : vector<128x128xi32>
    %22 = arith.extui %21 : vector<128x128xi1> to vector<128x128xi32>
    %23 = arith.sitofp %22 : vector<128x128xi32> to vector<128x128xf32>
    %24 = arith.addf %16, %23 : vector<128x128xf32>
    %25 = vector.extract_strided_slice %0 {offsets = [3, 0], sizes = [1, 128], strides = [1, 1]} : vector<4x128xi32> to vector<1x128xi32>
    %26 = vector.shape_cast %25 : vector<1x128xi32> to vector<128xi32>
    %27 = vector.shape_cast %26 : vector<128xi32> to vector<1x128xi32>
    %28 = vector.broadcast %27 : vector<1x128xi32> to vector<128x128xi32>
    %29 = arith.cmpi eq, %1, %28 : vector<128x128xi32>
    %30 = arith.extui %29 : vector<128x128xi1> to vector<128x128xi32>
    %31 = arith.sitofp %30 : vector<128x128xi32> to vector<128x128xf32>
    %32 = arith.addf %24, %31 : vector<128x128xf32>
    %c0_1 = arith.constant 0 : index
    %c0_2 = arith.constant 0 : index
    %33 = vector.load %arg2[%c0_1, %c0_2] : memref<128x128xf32, #tpu.memory_space<vmem>>, vector<128x128xf32>
    %cst = arith.constant dense<0.000000e+00> : vector<128x128xf32>
    %34 = tpu.matmul %33, %32, %cst {dimension_numbers = #tpu.dot_dimension_numbers<[1], [0], [0], [1], [0, 0, 1, 1], [], []>} : vector<128x128xf32>, vector<128x128xf32>, vector<128x128xf32> -> vector<128x128xf32>
    %c0_3 = arith.constant 0 : index
    %c0_4 = arith.constant 0 : index
    %35 = vector.load %arg3[%c0_3, %c0_4] : memref<128x1xf32, #tpu.memory_space<vmem>>, vector<128x1xf32>
    %36 = vector.broadcast %35 : vector<128x1xf32> to vector<128x128xf32>
    %37 = arith.mulf %32, %36 : vector<128x128xf32>
    %cst_5 = arith.constant dense<0.000000e+00> : vector<128xf32>
    %38 = vector.multi_reduction <add>, %37, %cst_5 [0] : vector<128x128xf32> to vector<128xf32>
    %39 = vector.shape_cast %38 : vector<128xf32> to vector<1x128xf32>
    %c0_6 = arith.constant 0 : index
    %c0_7 = arith.constant 0 : index
    %40 = vector.load %arg4[%c0_6, %c0_7] : memref<1x1xf32, #tpu.memory_space<vmem>>, vector<1x1xf32>
    %41 = vector.broadcast %40 : vector<1x1xf32> to vector<1x128xf32>
    %42 = arith.addf %39, %41 : vector<1x128xf32>
    %cst_8 = arith.constant dense<0.000000e+00> : vector<128xf32>
    %43 = vector.multi_reduction <add>, %34, %cst_8 [0] : vector<128x128xf32> to vector<128xf32>
    %44 = vector.shape_cast %43 : vector<128xf32> to vector<1x128xf32>
    %45 = arith.mulf %34, %34 : vector<128x128xf32>
    %cst_9 = arith.constant dense<0.000000e+00> : vector<128xf32>
    %46 = vector.multi_reduction <add>, %45, %cst_9 [0] : vector<128x128xf32> to vector<128xf32>
    %47 = vector.shape_cast %46 : vector<128xf32> to vector<1x128xf32>
    %48 = arith.mulf %44, %44 : vector<1x128xf32>
    %49 = arith.subf %48, %47 : vector<1x128xf32>
    %cst_10 = arith.constant 5.000000e-01 : f32
    %50 = vector.broadcast %cst_10 : f32 to vector<1x128xf32>
    %51 = arith.mulf %50, %49 : vector<1x128xf32>
    %c0_11 = arith.constant 0 : index
    %c0_12 = arith.constant 0 : index
    %52 = vector.load %arg5[%c0_11, %c0_12] : memref<32x128xf32, #tpu.memory_space<vmem>>, vector<32x128xf32>
    %cst_13 = arith.constant dense<0.000000e+00> : vector<32x128xf32>
    %53 = tpu.matmul %52, %34, %cst_13 {dimension_numbers = #tpu.dot_dimension_numbers<[1], [0], [0], [1], [0, 0, 1, 1], [], []>} : vector<32x128xf32>, vector<128x128xf32>, vector<32x128xf32> -> vector<32x128xf32>
    %c0_14 = arith.constant 0 : index
    %c0_15 = arith.constant 0 : index
    %54 = vector.load %arg6[%c0_14, %c0_15] : memref<32x1xf32, #tpu.memory_space<vmem>>, vector<32x1xf32>
    %55 = vector.broadcast %54 : vector<32x1xf32> to vector<32x128xf32>
    %56 = arith.addf %53, %55 : vector<32x128xf32>
    %cst_16 = arith.constant 0.000000e+00 : f32
    %57 = vector.broadcast %cst_16 : f32 to vector<32x128xf32>
    %58 = arith.maximumf %56, %57 : vector<32x128xf32>
    %c0_17 = arith.constant 0 : index
    %c0_18 = arith.constant 0 : index
    %59 = vector.load %arg7[%c0_17, %c0_18] : memref<16x32xf32, #tpu.memory_space<vmem>>, vector<16x32xf32>
    %cst_19 = arith.constant dense<0.000000e+00> : vector<16x128xf32>
    %60 = tpu.matmul %59, %58, %cst_19 {dimension_numbers = #tpu.dot_dimension_numbers<[1], [0], [0], [1], [0, 0, 1, 1], [], []>} : vector<16x32xf32>, vector<32x128xf32>, vector<16x128xf32> -> vector<16x128xf32>
    %c0_20 = arith.constant 0 : index
    %c0_21 = arith.constant 0 : index
    %61 = vector.load %arg8[%c0_20, %c0_21] : memref<16x1xf32, #tpu.memory_space<vmem>>, vector<16x1xf32>
    %62 = vector.broadcast %61 : vector<16x1xf32> to vector<16x128xf32>
    %63 = arith.addf %60, %62 : vector<16x128xf32>
    %cst_22 = arith.constant 0.000000e+00 : f32
    %64 = vector.broadcast %cst_22 : f32 to vector<16x128xf32>
    %65 = arith.maximumf %63, %64 : vector<16x128xf32>
    %c0_23 = arith.constant 0 : index
    %c0_24 = arith.constant 0 : index
    %66 = vector.load %arg9[%c0_23, %c0_24] : memref<16x1xf32, #tpu.memory_space<vmem>>, vector<16x1xf32>
    %67 = vector.broadcast %66 : vector<16x1xf32> to vector<16x128xf32>
    %68 = arith.mulf %65, %67 : vector<16x128xf32>
    %cst_25 = arith.constant dense<0.000000e+00> : vector<128xf32>
    %69 = vector.multi_reduction <add>, %68, %cst_25 [0] : vector<16x128xf32> to vector<128xf32>
    %70 = vector.shape_cast %69 : vector<128xf32> to vector<1x128xf32>
    %c0_26 = arith.constant 0 : index
    %c0_27 = arith.constant 0 : index
    %71 = vector.load %arg10[%c0_26, %c0_27] : memref<1x1xf32, #tpu.memory_space<vmem>>, vector<1x1xf32>
    %72 = vector.broadcast %71 : vector<1x1xf32> to vector<1x128xf32>
    %73 = arith.addf %70, %72 : vector<1x128xf32>
    %74 = arith.addf %42, %51 : vector<1x128xf32>
    %75 = arith.addf %74, %73 : vector<1x128xf32>
    %cst_28 = arith.constant 0.000000e+00 : f32
    %76 = vector.broadcast %cst_28 : f32 to vector<1x128xf32>
    %77 = arith.subf %76, %75 : vector<1x128xf32>
    %78 = math.exp %77 : vector<1x128xf32>
    %cst_29 = arith.constant 1.000000e+00 : f32
    %79 = vector.broadcast %cst_29 : f32 to vector<1x128xf32>
    %80 = arith.addf %79, %78 : vector<1x128xf32>
    %cst_30 = arith.constant 1.000000e+00 : f32
    %81 = vector.broadcast %cst_30 : f32 to vector<1x128xf32>
    %82 = arith.divf %81, %80 : vector<1x128xf32>
    %c0_31 = arith.constant 0 : index
    %c0_32 = arith.constant 0 : index
    %83 = vector.load %arg11[%c0_31, %c0_32] : memref<1x128xf32, #tpu.memory_space<vmem>>, vector<1x128xf32>
    tpu.vector_store %arg11[%c0_31, %c0_32], %82 {strides = array<i32>} : memref<1x128xf32, #tpu.memory_space<vmem>>, vector<1x128xf32>,
    return
  }
  func.func @transform_0(%arg0: i32) -> (i32, i32) {
    %c0_i32 = arith.constant 0 : i32
    %c0_i32_0 = arith.constant 0 : i32
    return %c0_i32, %arg0 : i32, i32
  }
  func.func @transform_1(%arg0: i32) -> (i32, i32) {
    %c0_i32 = arith.constant 0 : i32
    %c0_i32_0 = arith.constant 0 : i32
    %c0_i32_1 = arith.constant 0 : i32
    return %c0_i32, %c0_i32_0 : i32, i32
  }
  func.func @transform_2(%arg0: i32) -> (i32, i32) {
    %c0_i32 = arith.constant 0 : i32
    %c0_i32_0 = arith.constant 0 : i32
    %c0_i32_1 = arith.constant 0 : i32
    return %c0_i32, %c0_i32_0 : i32, i32
  }
  func.func @transform_3(%arg0: i32) -> (i32, i32) {
    %c0_i32 = arith.constant 0 : i32
    %c0_i32_0 = arith.constant 0 : i32
    %c0_i32_1 = arith.constant 0 : i32
    return %c0_i32, %c0_i32_0 : i32, i32
  }
  func.func @transform_4(%arg0: i32) -> (i32, i32) {
    %c0_i32 = arith.constant 0 : i32
    %c0_i32_0 = arith.constant 0 : i32
    %c0_i32_1 = arith.constant 0 : i32
    return %c0_i32, %c0_i32_0 : i32, i32
  }
  func.func @transform_5(%arg0: i32) -> (i32, i32) {
    %c0_i32 = arith.constant 0 : i32
    %c0_i32_0 = arith.constant 0 : i32
    %c0_i32_1 = arith.constant 0 : i32
    return %c0_i32, %c0_i32_0 : i32, i32
  }
  func.func @transform_6(%arg0: i32) -> (i32, i32) {
    %c0_i32 = arith.constant 0 : i32
    %c0_i32_0 = arith.constant 0 : i32
    %c0_i32_1 = arith.constant 0 : i32
    return %c0_i32, %c0_i32_0 : i32, i32
  }
  func.func @transform_7(%arg0: i32) -> (i32, i32) {
    %c0_i32 = arith.constant 0 : i32
    %c0_i32_0 = arith.constant 0 : i32
    %c0_i32_1 = arith.constant 0 : i32
    return %c0_i32, %c0_i32_0 : i32, i32
  }
  func.func @transform_8(%arg0: i32) -> (i32, i32) {
    %c0_i32 = arith.constant 0 : i32
    %c0_i32_0 = arith.constant 0 : i32
    %c0_i32_1 = arith.constant 0 : i32
    return %c0_i32, %c0_i32_0 : i32, i32
  }
  func.func @transform_9(%arg0: i32) -> (i32, i32) {
    %c0_i32 = arith.constant 0 : i32
    %c0_i32_0 = arith.constant 0 : i32
    %c0_i32_1 = arith.constant 0 : i32
    return %c0_i32, %c0_i32_0 : i32, i32
  }
  func.func @transform_10(%arg0: i32) -> (i32, i32) {
    %c0_i32 = arith.constant 0 : i32
    %c0_i32_0 = arith.constant 0 : i32
    return %c0_i32, %arg0 : i32, i32
  }
}

</mosaic_0001>

<bundles_post_ra>
// kernel: tpu_custom_call.1
= control target key start
LH: loop header
LB: loop body
LE: loop exit
PB: predicated region body
PF: predicated region fallthrough
CT: control target
= control target key end

     0   :  { %s2351_s0 = inlined_call_operand.vmem [shape: s32[4,256], index: 0, kind: input, shape index: {}]   ;;  %s2352_s1 = inlined_call_operand.vmem [shape: f32[128,128], index: 1, kind: input, shape index: {}]   ;;  %s2353_s2 = inlined_call_operand.vmem [shape: f32[128,1], index: 2, kind: input, shape index: {}]   ;;  %s2354_s3 = inlined_call_operand.<no memory space> [shape: f32[1,1], index: 3, kind: input, shape index: {}]   ;;  %s2355_s4 = inlined_call_operand.vmem [shape: f32[32,128], index: 4, kind: input, shape index: {}]   ;;  %s2356_s5 = inlined_call_operand.vmem [shape: f32[32,1], index: 5, kind: input, shape index: {}]   ;;  %s2357_s6 = inlined_call_operand.vmem [shape: f32[16,32], index: 6, kind: input, shape index: {}]   ;;  %s2358_s7 = inlined_call_operand.vmem [shape: f32[16,1], index: 7, kind: input, shape index: {}]   ;;  %s2359_s8 = inlined_call_operand.vmem [shape: f32[16,1], index: 8, kind: input, shape index: {}]   ;;  %s2360_s10 = inlined_call_operand.hbm [shape: f32[1,256], index: 10, kind: output, shape index: {}]   ;;  %s2361_s9 = inlined_call_operand.<no memory space> [shape: f32[1,1], index: 9, kind: input, shape index: {}]  }
   0x1   :  { %v15_v0 = vstv %s2354_s3  ;;  %v17_v1 = vstv %s2361_s9 }
   0x2   :  { %16 = vst [vmem:[#allocation2] sm:$0x1] %v15_v0  ;;  %18 = vst [vmem:[#allocation3] sm:$0x1] %v17_v1 }
   0x3   :  { %19 = vsyncpa [#allocation5], 0 }
   0x4   :  { %21 = vsyncpa [#allocation5 + $0x1], 0  ;;  %s1806_s17 = smov 0   ;;  %s1808_s18 = smov 0  }
   0x5   :  { %s1810_s19 = smov 0   ;;  %s1812_s20 = smov 0  }
   0x6 LB: > { %s1827_s3 = sadd.s32 4294967295, %s1740_s20   ;;  %s1322_s9 = sadd.s32 4294967294, %s1740_s20   ;;  %s1740_s20 = sphi %s1812_s20, %s2367_s20   ;;  %s1736_s19 = sphi %s1810_s19, %s2366_s19   ;;  %s1732_s18 = sphi %s1808_s18, %s2365_s18   ;;  %s1728_s17 = sphi %s1806_s17, %s2364_s17  }
   0x7   : > { %s1831_s21 = sadd.s32 1, %s1740_s20   ;;  %s249_s22 = sadd.s32 1, %s1736_s19 }
   0x8   : > { %s246_s23 = ssub.s32 %s1740_s20, %s1831_s21  ;;  %p259_p0 = scmp.ne.s32.totalorder %s1736_s19, %s1732_s18 }
   0x9   : > { %p247_p1 = scmp.eq.s32.totalorder %s246_s23, 0  ;;  %p260_p2 = scmp.eq.s32.totalorder %s1827_s3, 1 }
   0xa   : > { %p265_p3 = scmp.ne.s32.totalorder %s1732_s18, %s1728_s17  ;;  %p266_p4 = scmp.eq.s32.totalorder %s1322_s9, 1 }
   0xb   : > { %s1842_s24 = scalar_select %p247_p1, %s1736_s19, %s249_s22  }
   0xc   : > { %p1844_p5 = por %p260_p2, %p259_p0  ;;  %p1848_p6 = por %p266_p4, %p265_p3 }
   0xd   : > { %p1325_p7 = scmp.ge.s32.totalorder %s1740_s20, 1  ;;  %p318_p8 = scmp.lt.s32.totalorder %s1740_s20, 3 }
   0xf   : > { %p319_p9 = pnand %p1325_p7, %p318_p8 }
  0x10   : > { %p354_p10 = scmp.lt.s32.totalorder (!%p319_p9), %s1827_s3, 1  ;;  %v359_v2 = vlaneseq (!%p319_p9)  ;;  %v632_v3 = vld [vmem:[%s2352_s1] sm:$0xff] (!%p319_p9)  ;;  %v1742_v4 = vmov (!%p319_p9), 0   ;;  %v1004_v23 = vld [vmem:[%s2356_s5 + $0x10] sm:$0xff] (!%p319_p9)  ;;  %v1005_v29 = vld [vmem:[%s2356_s5 + $0x18] sm:$0xff] (!%p319_p9)  ;;  %v1743_v31 = vmov (!%p319_p9), 0.0  }
  0x11   : > { %322 = sbr.rel (%p319_p9) target bundleno = 840 (0x348), region = 60  ;;  %1486 = vmatprep.mubr.f32.mxu0 (!%p319_p9), %v632_v3  ;;  %1673 = vset.pattern.permute.xlu1 (!%p319_p9), %v1742_v4  ;;  %v1002_v24 = vld [vmem:[%s2356_s5] sm:$0xff] (!%p319_p9)  ;;  %v1003_v30 = vld [vmem:[%s2356_s5 + $0x8] sm:$0xff] (!%p319_p9)  ;;  %v796_v56 = vld [vmem:[%s2353_s2 + $0x18] sm:$0xff] (!%p319_p9)  ;;  %s1393_s14 = sshll.u32 (!%p319_p9), %s1827_s3, 4 }
  0x12   : > { %v1859_v5 = vshrl.u32 (!%p319_p9), %v359_v2, 7  ;;  %1672 = vset.pattern.permute.xlu0 (!%p319_p9), %v1742_v4  ;;  %1018 = vperm.xlu1 (!%p319_p9), %1673, %v1004_v23   ;;  %v794_v44 = vld [vmem:[%s2353_s2 + $0x8] sm:$0xff] (!%p319_p9)  ;;  %v793_v45 = vld [vmem:[%s2353_s2] sm:$0xff] (!%p319_p9)  ;;  %v795_v58 = vld [vmem:[%s2353_s2 + $0x10] sm:$0xff] (!%p319_p9)  ;;  %s2309_s23 = scalar_lea.hbm (!%p319_p9), %s2360_s10, %s1393_s14 }
  0x13   : > { %1008 = vperm.xlu0 (!%p319_p9), %1672, %v1002_v24   ;;  %v798_v4 = vld [vmem:[%s2353_s2 + $0x28] sm:$0xff] (!%p319_p9) }
  0x14   : > { %v361_v6 = vadd.s32 (!%p319_p9), 8, %v1859_v5  ;;  %v1863_v7 = vsub.s32 (!%p319_p9), 0, %v1859_v5  ;;  %v430_v8 = vsub.s32 (!%p319_p9), 1, %v1859_v5  ;;  %v498_v9 = vsub.s32 (!%p319_p9), 2, %v1859_v5 }
  0x15   : > { %v566_v10 = vsub.s32 (!%p319_p9), 3, %v1859_v5  ;;  %v1872_v11 = vadd.s32 (!%p319_p9), 16, %v1859_v5  ;;  %v1875_v12 = vadd.s32 (!%p319_p9), 24, %v1859_v5  ;;  %v1878_v13 = vadd.s32 (!%p319_p9), 32, %v1859_v5 }
  0x16   : > { %v1881_v15 = vadd.s32 (!%p319_p9), 40, %v1859_v5  ;;  %v1884_v16 = vadd.s32 (!%p319_p9), 48, %v1859_v5  ;;  %v1887_v17 = vadd.s32 (!%p319_p9), 56, %v1859_v5  ;;  %v1890_v18 = vadd.s32 (!%p319_p9), 64, %v1859_v5  ;;  %1023 = vperm.xlu1 (!%p319_p9), %1673, %v1005_v29  }
  0x17   : > { %v1908_v25 = vadd.s32 (!%p319_p9), 72, %v1859_v5  ;;  %v1911_v26 = vadd.s32 (!%p319_p9), 80, %v1859_v5  ;;  %v1914_v27 = vadd.s32 (!%p319_p9), 88, %v1859_v5  ;;  %v1917_v28 = vadd.s32 (!%p319_p9), 96, %v1859_v5  ;;  %1013 = vperm.xlu0 (!%p319_p9), %1672, %v1003_v30  }
  0x18   : > { %s355_s29 = scalar_select %p354_p10, %s1827_s3, 1 }
  0x19   : > { %s1744_s3 = smov [#allocation4]  }
  0x1a   : > { %s1326_s30 = sshll.u32 %s355_s29, 2  ;;  %816 = vperm.xlu1 %1673, %v794_v44   ;;  %s1682_s29 = sshll.u32 %s1744_s3, 4  ;;  %s1683_s29 = int_to_ptr.vmem [resolvable:$false] %s1682_s29 }
  0x1b   : > { %s357_s13 = scalar_lea.vmem %s2351_s0, %s1326_s30  ;;  %811 = vperm.xlu0 %1672, %v793_v45   ;;  %s1684_s30 = scalar_lea.vmem %s1683_s29, 32 }
  0x1c   : > { %v358_v14 = vld [vmem:[%s357_s13] sm:$0xf]  ;;  %s352_s13 = sand.u32 1, %s1732_s18  }
  0x1d   : > { %v1893_v19 = vrot.slane %v358_v14, %v1863_v7  ;;  %v1895_v20 = vrot.slane %v358_v14, %v430_v8  ;;  %v1897_v21 = vrot.slane %v358_v14, %v498_v9  ;;  %v1899_v22 = vrot.slane %v358_v14, %v566_v10  ;;  %v797_v9 = vld [vmem:[%s2353_s2 + $0x20] sm:$0xff]  ;;  %s353_s15 = scalar_lea.vmem [#allocation4], %s352_s13  ;;  %s1255_s27 = scalar_lea.sflag [#allocation5], %s352_s13 }
  0x1e   : > { %826 = vperm.xlu1 %1673, %v796_v56   ;;  %s1267_s16 = sshll.u32 %s353_s15, 4  ;;  %s2311_s16 = int_to_ptr.vmem [resolvable:$true] %s1267_s16 }
  0x1f   : > { %vm380_vm0 = vcmp.eq.s32.totalorder %v1859_v5, %v1893_v19  ;;  %vm381_vm1 = vcmp.eq.s32.totalorder %v361_v6, %v1893_v19  ;;  %vm432_vm2 = vcmp.eq.s32.totalorder %v1859_v5, %v1895_v20  ;;  %vm433_vm3 = vcmp.eq.s32.totalorder %v361_v6, %v1895_v20  ;;  %821 = vperm.xlu0 %1672, %v795_v58   ;;  %s1678_s28 = scalar_lea.vmem %s2311_s16, 16  ;;  %p1685_p0 = scmp.lt.s32.totalorder %s2311_s16, %s1683_s29 }
  0x20   : > { %v1327_v32 = vsel %vm380_vm0, 1.0, %v1743_v31  ;;  %v1328_v33 = vsel %vm381_vm1, 1.0, %v1743_v31  ;;  %v1343_v34 = vsel %vm432_vm2, 1.0, %v1743_v31  ;;  %v1344_v35 = vsel %vm433_vm3, 1.0, %v1743_v31  ;;  %p1679_p11 = scmp.ne.s32.totalorder %s2311_s16, %s1678_s28  ;;  %p1686_p1 = scmp.lt.s32.totalorder %s1684_s30, %s1678_s28 }
  0x21   : > { %v480_v36 = vadd.f32 %v1343_v34, %v1327_v32  ;;  %v481_v37 = vadd.f32 %v1344_v35, %v1328_v33  ;;  %vm500_vm4 = vcmp.eq.s32.totalorder %v1859_v5, %v1897_v21  ;;  %vm501_vm5 = vcmp.eq.s32.totalorder %v361_v6, %v1897_v21  ;;  %v799_v34 = vld [vmem:[%s2353_s2 + $0x30] sm:$0xff] }
  0x22   : > { %v1359_v38 = vsel %vm500_vm4, 1.0, %v1743_v31  ;;  %v1360_v39 = vsel %vm501_vm5, 1.0, %v1743_v31  ;;  %vm568_vm6 = vcmp.eq.s32.totalorder %v1859_v5, %v1899_v22  ;;  %vm569_vm7 = vcmp.eq.s32.totalorder %v361_v6, %v1899_v22  ;;  %836 = vperm.xlu1 %1673, %v798_v4   ;;  %p1680_p12 = pnand %p1679_p11, %p1844_p5  ;;  %p1687_p2 = por %p1686_p1, %p1685_p0 }
  0x23   : > { %v548_v40 = vadd.f32 %v1359_v38, %v480_v36  ;;  %v549_v41 = vadd.f32 %v1360_v39, %v481_v37  ;;  %v1375_v42 = vsel %vm568_vm6, 1.0, %v1743_v31  ;;  %v1376_v43 = vsel %vm569_vm7, 1.0, %v1743_v31  ;;  %831 = vperm.xlu0 %1672, %v797_v9  }
  0x24   : > { %vm382_vm8 = vcmp.eq.s32.totalorder %v1872_v11, %v1893_v19  ;;  %vm383_vm9 = vcmp.eq.s32.totalorder %v1875_v12, %v1893_v19  ;;  %vm434_vm10 = vcmp.eq.s32.totalorder %v1872_v11, %v1895_v20  ;;  %vm435_vm11 = vcmp.eq.s32.totalorder %v1875_v12, %v1895_v20  ;;  %p1681_p13 = pneg %p1680_p12 }
  0x25   : > { %v1959_v46 = vadd.f32 %v1375_v42, %v548_v40  ;;  %v1961_v47 = vadd.f32 %v1376_v43, %v549_v41  ;;  %v1329_v48 = vsel %vm382_vm8, 1.0, %v1743_v31  ;;  %v1330_v49 = vsel %vm383_vm9, 1.0, %v1743_v31  ;;  %v802_v43 = vld [vmem:[%s2353_s2 + $0x48] sm:$0xff] }
  0x26   : > { %v1345_v50 = vsel %vm434_vm10, 1.0, %v1743_v31  ;;  %v1346_v51 = vsel %vm435_vm11, 1.0, %v1743_v31  ;;  %vm502_vm12 = vcmp.eq.s32.totalorder %v1872_v11, %v1897_v21  ;;  %vm503_vm13 = vcmp.eq.s32.totalorder %v1875_v12, %v1897_v21  ;;  %p1688_p3 = pnand %p1687_p2, %p1681_p13 }
  0x27   : > { %v1559_v52 = vpack.c.bf16 %v1961_v47, %v1959_v46  ;;  %v482_v53 = vadd.f32 %v1345_v50, %v1329_v48  ;;  %v483_v54 = vadd.f32 %v1346_v51, %v1330_v49  ;;  %v1361_v55 = vsel %vm502_vm12, 1.0, %v1743_v31  ;;  %841 = vperm.xlu0 %1672, %v799_v34   ;;  %v801_v48 = vld [vmem:[%s2353_s2 + $0x40] sm:$0xff] }
  0x28   : > { %v1362_v57 = vsel %vm503_vm13, 1.0, %v1743_v31  ;;  %vm570_vm14 = vcmp.eq.s32.totalorder %v1872_v11, %v1899_v22  ;;  %vm571_vm15 = vcmp.eq.s32.totalorder %v1875_v12, %v1899_v22  ;;  %vm384_vm0 = vcmp.eq.s32.totalorder %v1878_v13, %v1893_v19 }
  0x29   : > { %1560 = vmatprep.subr.bf16.mxu0 %v1559_v52  ;;  %v550_v59 = vadd.f32 %v1361_v55, %v482_v53  ;;  %v551_v60 = vadd.f32 %v1362_v57, %v483_v54  ;;  %v1377_v61 = vsel %vm570_vm14, 1.0, %v1743_v31  ;;  %v1378_v62 = vsel %vm571_vm15, 1.0, %v1743_v31  ;;  %v804_v55 = vld [vmem:[%s2353_s2 + $0x58] sm:$0xff] }
  0x2a   : > { %1562 = vmatpush3.bf16.msra.mxu0 %v1559_v52  ;;  %vm385_vm1 = vcmp.eq.s32.totalorder %v1881_v15, %v1893_v19  ;;  %v1331_v63 = vsel %vm384_vm0, 1.0, %v1743_v31  ;;  %vm436_vm2 = vcmp.eq.s32.totalorder %v1878_v13, %v1895_v20  ;;  %vm437_vm3 = vcmp.eq.s32.totalorder %v1881_v15, %v1895_v20 }
  0x2b   : > { %v1996_v0 = vadd.f32 %v1377_v61, %v550_v59  ;;  %v1998_v1 = vadd.f32 %v1378_v62, %v551_v60  ;;  %v1332_v2 = vsel %vm385_vm1, 1.0, %v1743_v31  ;;  %v1347_v3 = vsel %vm436_vm2, 1.0, %v1743_v31  ;;  %851 = vperm.xlu0 %1672, %v801_v48   ;;  %v803_v61 = vld [vmem:[%s2353_s2 + $0x50] sm:$0xff] }
  0x2c   : > { %v1348_v6 = vsel %vm437_vm3, 1.0, %v1743_v31  ;;  %v484_v8 = vadd.f32 %v1347_v3, %v1331_v63  ;;  %vm504_vm4 = vcmp.eq.s32.totalorder %v1878_v13, %v1897_v21  ;;  %vm505_vm5 = vcmp.eq.s32.totalorder %v1881_v15, %v1897_v21 }
  0x2d   : > { %v1563_v10 = vpack.c.bf16 %v1998_v1, %v1996_v0  ;;  %v485_v11 = vadd.f32 %v1348_v6, %v1332_v2  ;;  %v1363_v12 = vsel %vm504_vm4, 1.0, %v1743_v31  ;;  %v1364_v14 = vsel %vm505_vm5, 1.0, %v1743_v31 }
  0x2e   : > { %v552_v23 = vadd.f32 %v1363_v12, %v484_v8  ;;  %vm572_vm6 = vcmp.eq.s32.totalorder %v1878_v13, %v1899_v22  ;;  %vm573_vm7 = vcmp.eq.s32.totalorder %v1881_v15, %v1899_v22  ;;  %vm386_vm8 = vcmp.eq.s32.totalorder %v1884_v16, %v1893_v19  ;;  %v800_v13 = vld [vmem:[%s2353_s2 + $0x38] sm:$0xff] }
  0x2f   : > { %1564 = vmatprep.subr.bf16.mxu0 %v1563_v10  ;;  %v553_v24 = vadd.f32 %v1364_v14, %v485_v11  ;;  %v1379_v29 = vsel %vm572_vm6, 1.0, %v1743_v31  ;;  %v1380_v30 = vsel %vm573_vm7, 1.0, %v1743_v31  ;;  %vm387_vm9 = vcmp.eq.s32.totalorder %v1887_v17, %v1893_v19  ;;  %846 = vperm.xlu1 %1673, %v800_v13   ;;  %v805_v11 = vld [vmem:[%s2353_s2 + $0x60] sm:$0xff] }
  0x30   : > { %1566 = vmatpush3.bf16.msra.mxu0 %v1563_v10  ;;  %v2030_v15 = vadd.f32 %v1379_v29, %v552_v23  ;;  %v1333_v32 = vsel %vm386_vm8, 1.0, %v1743_v31  ;;  %v1334_v33 = vsel %vm387_vm9, 1.0, %v1743_v31  ;;  %vm438_vm10 = vcmp.eq.s32.totalorder %v1884_v16, %v1895_v20  ;;  %861 = vperm.xlu0 %1672, %v803_v61   ;;  %v1117_v13 = vld [vmem:[%s2358_s7] sm:$0xff] }
  0x31   : > { %v2039_v35 = vadd.f32 %v1380_v30, %v553_v24  ;;  %vm439_vm11 = vcmp.eq.s32.totalorder %v1887_v17, %v1895_v20  ;;  %v1349_v36 = vsel %vm438_vm10, 1.0, %v1743_v31  ;;  %vm506_vm12 = vcmp.eq.s32.totalorder %v1884_v16, %v1897_v21 }
  0x32   : > { %v1350_v37 = vsel %vm439_vm11, 1.0, %v1743_v31  ;;  %v486_v38 = vadd.f32 %v1349_v36, %v1333_v32  ;;  %vm507_vm13 = vcmp.eq.s32.totalorder %v1887_v17, %v1897_v21  ;;  %v1365_v39 = vsel %vm506_vm12, 1.0, %v1743_v31 }
  0x33   : > { %v1567_v40 = vpack.c.bf16 %v2039_v35, %v2030_v15  ;;  %v487_v41 = vadd.f32 %v1350_v37, %v1334_v33  ;;  %v1366_v42 = vsel %vm507_vm13, 1.0, %v1743_v31  ;;  %vm574_vm14 = vcmp.eq.s32.totalorder %v1884_v16, %v1899_v22  ;;  %856 = vperm.xlu1 %1673, %v802_v43  }
  0x34   : > { %v554_v44 = vadd.f32 %v1365_v39, %v486_v38  ;;  %vm575_vm15 = vcmp.eq.s32.totalorder %v1887_v17, %v1899_v22  ;;  %v1381_v45 = vsel %vm574_vm14, 1.0, %v1743_v31  ;;  %vm388_vm0 = vcmp.eq.s32.totalorder %v1890_v18, %v1893_v19  ;;  %871 = vperm.xlu0 %1672, %v805_v11  }
  0x35   : > { %1568 = vmatprep.subr.bf16.mxu0 %v1567_v40  ;;  %v555_v16 = vadd.f32 %v1366_v42, %v487_v41  ;;  %v1382_v49 = vsel %vm575_vm15, 1.0, %v1743_v31  ;;  %vm389_vm1 = vcmp.eq.s32.totalorder %v1908_v25, %v1893_v19  ;;  %v1335_v50 = vsel %vm388_vm0, 1.0, %v1743_v31  ;;  %v808_v42 = vld [vmem:[%s2353_s2 + $0x78] sm:$0xff] }
  0x36   : > { %1570 = vmatpush3.bf16.msra.mxu0 %v1567_v40  ;;  %v2070_v17 = vadd.f32 %v1381_v45, %v554_v44  ;;  %v1336_v51 = vsel %vm389_vm1, 1.0, %v1743_v31  ;;  %vm440_vm2 = vcmp.eq.s32.totalorder %v1890_v18, %v1895_v20  ;;  %vm441_vm3 = vcmp.eq.s32.totalorder %v1908_v25, %v1895_v20 }
  0x37   : > { %v2077_v52 = vadd.f32 %v1382_v49, %v555_v16  ;;  %v1351_v53 = vsel %vm440_vm2, 1.0, %v1743_v31  ;;  %v1352_v54 = vsel %vm441_vm3, 1.0, %v1743_v31  ;;  %vm508_vm4 = vcmp.eq.s32.totalorder %v1890_v18, %v1897_v21  ;;  %866 = vperm.xlu1 %1673, %v804_v55  }
  0x38   : > { %v488_v56 = vadd.f32 %v1351_v53, %v1335_v50  ;;  %v489_v57 = vadd.f32 %v1352_v54, %v1336_v51  ;;  %vm509_vm5 = vcmp.eq.s32.totalorder %v1908_v25, %v1897_v21  ;;  %v1367_v58 = vsel %vm508_vm4, 1.0, %v1743_v31  ;;  %v1118_v50 = vld [vmem:[%s2358_s7 + $0x8] sm:$0xff] }
  0x39   : > { %v1571_v59 = vpack.c.bf16 %v2077_v52, %v2070_v17  ;;  %v1368_v60 = vsel %vm509_vm5, 1.0, %v1743_v31  ;;  %vm576_vm6 = vcmp.eq.s32.totalorder %v1890_v18, %v1899_v22  ;;  %vm577_vm7 = vcmp.eq.s32.totalorder %v1908_v25, %v1899_v22  ;;  %v806_v18 = vld [vmem:[%s2353_s2 + $0x68] sm:$0xff] }
  0x3a   : > { %v556_v62 = vadd.f32 %v1367_v58, %v488_v56  ;;  %v557_v63 = vadd.f32 %v1368_v60, %v489_v57  ;;  %v1383_v2 = vsel %vm576_vm6, 1.0, %v1743_v31  ;;  %v1384_v3 = vsel %vm577_vm7, 1.0, %v1743_v31  ;;  %v1213_v60 = vld [vmem:[%s2359_s8] sm:$0xff] }
  0x3b   : > { %1572 = vmatprep.subr.bf16.mxu0 %v1571_v59  ;;  %vm390_vm8 = vcmp.eq.s32.totalorder %v1911_v26, %v1893_v19  ;;  %vm391_vm9 = vcmp.eq.s32.totalorder %v1914_v27, %v1893_v19  ;;  %vm442_vm10 = vcmp.eq.s32.totalorder %v1911_v26, %v1895_v20  ;;  %vm443_vm11 = vcmp.eq.s32.totalorder %v1914_v27, %v1895_v20 }
  0x3c   : > { %1574 = vmatpush3.bf16.msra.mxu0 %v1571_v59  ;;  %v2112_v25 = vadd.f32 %v1383_v2, %v556_v62  ;;  %v2114_v4 = vadd.f32 %v1384_v3, %v557_v63  ;;  %v1337_v6 = vsel %vm390_vm8, 1.0, %v1743_v31  ;;  %v1338_v8 = vsel %vm391_vm9, 1.0, %v1743_v31  ;;  %876 = vperm.xlu1 %1673, %v806_v18  }
  0x3d   : > { %v1353_v9 = vsel %vm442_vm10, 1.0, %v1743_v31  ;;  %v1354_v10 = vsel %vm443_vm11, 1.0, %v1743_v31  ;;  %vm510_vm12 = vcmp.eq.s32.totalorder %v1911_v26, %v1897_v21  ;;  %vm511_vm13 = vcmp.eq.s32.totalorder %v1914_v27, %v1897_v21 }
  0x3e   : > { %v1575_v12 = vpack.c.bf16 %v2114_v4, %v2112_v25  ;;  %v490_v14 = vadd.f32 %v1353_v9, %v1337_v6  ;;  %v491_v23 = vadd.f32 %v1354_v10, %v1338_v8  ;;  %v1369_v24 = vsel %vm510_vm12, 1.0, %v1743_v31  ;;  %v926_v9 = vld [vmem:[#allocation2] sm:$0x1] }
  0x3f   : > { %v1370_v29 = vsel %vm511_vm13, 1.0, %v1743_v31  ;;  %vm578_vm14 = vcmp.eq.s32.totalorder %v1911_v26, %v1899_v22  ;;  %vm579_vm15 = vcmp.eq.s32.totalorder %v1914_v27, %v1899_v22  ;;  %v373_v30 = vadd.s32 104, %v1859_v5  ;;  %v807_v26 = vld [vmem:[%s2353_s2 + $0x70] sm:$0xff] }
  0x40   : > { %1576 = vmatprep.subr.bf16.mxu0 %v1575_v12  ;;  %v558_v32 = vadd.f32 %v1369_v24, %v490_v14  ;;  %v559_v33 = vadd.f32 %v1370_v29, %v491_v23  ;;  %v1385_v34 = vsel %vm578_vm14, 1.0, %v1743_v31  ;;  %v1386_v36 = vsel %vm579_vm15, 1.0, %v1743_v31  ;;  %1121 = vperm.xlu1 %1673, %v1117_v13   ;;  %v636_v14 = vld [vmem:[%s2352_s1 + $0x20] sm:$0xff]  ;;  %v637_v23 = vld [vmem:[%s2352_s1 + $0x28] sm:$0xff]  ;;  %v638_v24 = vld [vmem:[%s2352_s1 + $0x30] sm:$0xff] }
  0x41   : > { %1578 = vmatpush3.bf16.msra.mxu0 %v1575_v12  ;;  %vm392_vm0 = vcmp.eq.s32.totalorder %v1917_v28, %v1893_v19  ;;  %vm393_vm1 = vcmp.eq.s32.totalorder %v373_v30, %v1893_v19  ;;  %vm444_vm2 = vcmp.eq.s32.totalorder %v1917_v28, %v1895_v20  ;;  %vm445_vm3 = vcmp.eq.s32.totalorder %v373_v30, %v1895_v20  ;;  %v634_v12 = vld [vmem:[%s2352_s1 + $0x10] sm:$0xff]  ;;  %v639_v29 = vld [vmem:[%s2352_s1 + $0x38] sm:$0xff]  ;;  %v641_v13 = vld [vmem:[%s2352_s1 + $0x48] sm:$0xff] }
  0x42   : > { %v2150_v27 = vadd.f32 %v1385_v34, %v558_v32  ;;  %v2152_v37 = vadd.f32 %v1386_v36, %v559_v33  ;;  %v1339_v38 = vsel %vm392_vm0, 1.0, %v1743_v31  ;;  %v1340_v39 = vsel %vm393_vm1, 1.0, %v1743_v31  ;;  %881 = vperm.xlu0 %1672, %v807_v26   ;;  %v642_v32 = vld [vmem:[%s2352_s1 + $0x50] sm:$0xff]  ;;  %v643_v33 = vld [vmem:[%s2352_s1 + $0x58] sm:$0xff]  ;;  %v644_v34 = vld [vmem:[%s2352_s1 + $0x60] sm:$0xff] }
  0x43   : > { %v1355_v40 = vsel %vm444_vm2, 1.0, %v1743_v31  ;;  %v1356_v41 = vsel %vm445_vm3, 1.0, %v1743_v31  ;;  %vm512_vm4 = vcmp.eq.s32.totalorder %v1917_v28, %v1897_v21  ;;  %vm513_vm5 = vcmp.eq.s32.totalorder %v373_v30, %v1897_v21  ;;  %v645_v36 = vld [vmem:[%s2352_s1 + $0x68] sm:$0xff]  ;;  %v646_v26 = vld [vmem:[%s2352_s1 + $0x70] sm:$0xff] }
  0x44   : > { %v1579_v43 = vpack.c.bf16 %v2152_v37, %v2150_v27  ;;  %v492_v44 = vadd.f32 %v1355_v40, %v1339_v38  ;;  %v493_v45 = vadd.f32 %v1356_v41, %v1340_v39  ;;  %v1371_v48 = vsel %vm512_vm4, 1.0, %v1743_v31  ;;  %886 = vperm.xlu1 %1673, %v808_v42   ;;  %v647_v38 = vld [vmem:[%s2352_s1 + $0x78] sm:$0xff]  ;;  %v998_v39 = vld [vmem:[%s2355_s4] sm:$0xff]  ;;  %v1214_v40 = vld [vmem:[%s2359_s8 + $0x8] sm:$0xff] }
  0x45   : > { %v1372_v16 = vsel %vm513_vm5, 1.0, %v1743_v31  ;;  %vm580_vm6 = vcmp.eq.s32.totalorder %v1917_v28, %v1899_v22  ;;  %vm581_vm7 = vcmp.eq.s32.totalorder %v373_v30, %v1899_v22  ;;  %v374_v49 = vadd.s32 112, %v1859_v5  ;;  %v640_v30 = vld [vmem:[%s2352_s1 + $0x40] sm:$0xff]  ;;  %1542 = vmatprep.mubr.f32.mxu1 %v998_v39 }
  0x46   : > { %1580 = vmatprep.subr.bf16.mxu0 %v1579_v43  ;;  %v560_v51 = vadd.f32 %v1371_v48, %v492_v44  ;;  %v561_v53 = vadd.f32 %v1372_v16, %v493_v45  ;;  %v1387_v54 = vsel %vm580_vm6, 1.0, %v1743_v31  ;;  %v1388_v55 = vsel %vm581_vm7, 1.0, %v1743_v31  ;;  %1126 = vperm.xlu0 %1672, %v1118_v50   ;;  %v1234_v41 = vld [vmem:[#allocation3] sm:$0x1] }
  0x47   : > { %1582 = vmatpush3.bf16.msra.mxu0 %v1579_v43  ;;  %v375_v56 = vadd.s32 120, %v1859_v5  ;;  %vm394_vm8 = vcmp.eq.s32.totalorder %v374_v49, %v1893_v19  ;;  %vm446_vm9 = vcmp.eq.s32.totalorder %v374_v49, %v1895_v20  ;;  %vm514_vm10 = vcmp.eq.s32.totalorder %v374_v49, %v1897_v21 }
  0x48   : > { %v2181_v28 = vadd.f32 %v1387_v54, %v560_v51  ;;  %v2183_v57 = vadd.f32 %v1388_v55, %v561_v53  ;;  %v1341_v58 = vsel %vm394_vm8, 1.0, %v1743_v31  ;;  %v1357_v59 = vsel %vm446_vm9, 1.0, %v1743_v31  ;;  %1222 = vperm.xlu1 %1673, %v1214_v40  }
  0x49   : > { %vm395_vm11 = vcmp.eq.s32.totalorder %v375_v56, %v1893_v19  ;;  %vm447_vm12 = vcmp.eq.s32.totalorder %v375_v56, %v1895_v20  ;;  %v494_v5 = vadd.f32 %v1357_v59, %v1341_v58  ;;  %vm515_vm13 = vcmp.eq.s32.totalorder %v375_v56, %v1897_v21 }
  0x4a   : > { %v1583_v61 = vpack.c.bf16 %v2183_v57, %v2181_v28  ;;  %v1342_v62 = vsel %vm395_vm11, 1.0, %v1743_v31  ;;  %v1358_v63 = vsel %vm447_vm12, 1.0, %v1743_v31  ;;  %v1373_v2 = vsel %vm514_vm10, 1.0, %v1743_v31  ;;  %1217 = vperm.xlu0 %1672, %v1213_v60  }
  0x4b   : > { %v495_v3 = vadd.f32 %v1358_v63, %v1342_v62  ;;  %v1374_v19 = vsel %vm515_vm13, 1.0, %v1743_v31  ;;  %v562_v20 = vadd.f32 %v1373_v2, %v494_v5  ;;  %vm582_vm14 = vcmp.eq.s32.totalorder %v374_v49, %v1899_v22 }
  0x4c   : > { %1584 = vmatprep.subr.bf16.mxu0 %v1583_v61  ;;  %vm583_vm15 = vcmp.eq.s32.totalorder %v375_v56, %v1899_v22  ;;  %v1389_v21 = vsel %vm582_vm14, 1.0, %v1743_v31  ;;  %v633_v22 = vld [vmem:[%s2352_s1 + $0x8] sm:$0xff]  ;;  %1237 = vperm.xlu1 %1673, %v1234_v41   ;;  %vm1129_vm0 = vcmask 261120  }
  0x4d   : > { %1586 = vmatpush3.bf16.msra.mxu0 %v1583_v61  ;;  %v563_v18 = vadd.f32 %v1374_v19, %v495_v3  ;;  %v1390_v6 = vsel %vm583_vm15, 1.0, %v1743_v31  ;;  %v2203_v8 = vadd.f32 %v1389_v21, %v562_v20  ;;  %v635_v31 = vld [vmem:[%s2352_s1 + $0x18] sm:$0xff] }
  0x4e   : > { %929 = vperm.xlu0 %1672, %v926_v9  }
  0x4f   : > { %v2205_v10 = vadd.f32 %v1390_v6, %v563_v18 }
  0x51   : > { %v1587_v11 = vpack.c.bf16 %v2205_v10, %v2203_v8 }
  0x53   : > { %1588 = vmatprep.subr.bf16.mxu0 %v1587_v11 }
  0x54   : > { %1590 = vmatpush3.bf16.msra.mxu0 %v1587_v11 }
  0x57   : > { %1487 = vmatmul.mubr.f32.vlgmr.msra.gmra.mrb[0].mxu0 %v633_v22 }
  0x58   : > { %1489 = vmatprep.mubr.f32.mxu0 %v634_v12 }
  0x5b   : > { %1490 = vmatmul.mubr.f32.gmra.mrb[2].mxu0 %v635_v31 }
  0x5c   : > { %1492 = vmatprep.mubr.f32.mxu0 %v636_v14 }
  0x5f   : > { %1493 = vmatmul.mubr.f32.gmra.mrb[4].mxu0 %v637_v23 }
  0x60   : > { %1495 = vmatprep.mubr.f32.mxu0 %v638_v24 }
  0x63   : > { %1496 = vmatmul.mubr.f32.gmra.mrb[6].mxu0 %v639_v29 }
  0x64   : > { %1498 = vmatprep.mubr.f32.mxu0 %v640_v30 }
  0x67   : > { %1499 = vmatmul.mubr.f32.gmra.mrb[8].mxu0 %v641_v13 }
  0x68   : > { %1501 = vmatprep.mubr.f32.mxu0 %v642_v32 }
  0x6b   : > { %1502 = vmatmul.mubr.f32.gmra.mrb[10].mxu0 %v643_v33 }
  0x6c   : > { %1504 = vmatprep.mubr.f32.mxu0 %v644_v34 }
  0x6f   : > { %1505 = vmatmul.mubr.f32.gmra.mrb[12].mxu0 %v645_v36 }
  0x70   : > { %1507 = vmatprep.mubr.f32.mxu0 %v646_v26 }
  0x73   : > { %1508 = vmatmul.mubr.f32.gmra.mrb[14].mxu0 %v647_v38 }
 0x12a   : > { %v1488_v42 = vpop.f32.mrb[0].mxu0 }
 0x12b   : > { %v959_v43 = vmul.f32 %v1488_v42, %v1488_v42  ;;  %v714_v44 = vpop.f32.mrb[1].mxu0 }
 0x12c   : > { %v937_v45 = vadd.f32 %v1488_v42, %v714_v44  ;;  %v958_v48 = vmul.f32 %v714_v44, %v714_v44  ;;  %v1591_v16 = vpack.c.bf16 %v1488_v42, %v714_v44 }
 0x12e   : > { %v974_v49 = vadd.f32 %v959_v43, %v958_v48  ;;  %v1491_v50 = vpop.f32.mrb[2].mxu0  ;;  %1592 = vmatprep.subr.bf16.mxu1 %v1591_v16 }
 0x12f   : > { %v724_v51 = vpop.f32.mrb[3].mxu0  ;;  %1594 = vmatpush3.bf16.msra.mxu1 %v1591_v16  ;;  %v961_v56 = vmul.f32 %v1491_v50, %v1491_v50 }
 0x130   : > { %v938_v53 = vadd.f32 %v937_v45, %v724_v51  ;;  %v960_v54 = vmul.f32 %v724_v51, %v724_v51  ;;  %v1595_v55 = vpack.c.bf16 %v1491_v50, %v724_v51 }
 0x132   : > { %v975_v58 = vadd.f32 %v974_v49, %v960_v54  ;;  %v1494_v59 = vpop.f32.mrb[4].mxu0  ;;  %1596 = vmatprep.subr.bf16.mxu1 %v1595_v55  ;;  %v939_v5 = vadd.f32 %v1491_v50, %v938_v53 }
 0x133   : > { %v734_v60 = vpop.f32.mrb[5].mxu0  ;;  %1598 = vmatpush3.bf16.msra.mxu1 %v1595_v55  ;;  %v963_v3 = vmul.f32 %v1494_v59, %v1494_v59 }
 0x134   : > { %v940_v61 = vadd.f32 %v939_v5, %v734_v60  ;;  %v962_v62 = vmul.f32 %v734_v60, %v734_v60  ;;  %v976_v63 = vadd.f32 %v975_v58, %v961_v56  ;;  %v1599_v2 = vpack.c.bf16 %v1494_v59, %v734_v60 }
 0x136   : > { %v977_v19 = vadd.f32 %v976_v63, %v962_v62  ;;  %v1497_v20 = vpop.f32.mrb[6].mxu0  ;;  %1600 = vmatprep.subr.bf16.mxu1 %v1599_v2  ;;  %v941_v21 = vadd.f32 %v1494_v59, %v940_v61 }
 0x137   : > { %v744_v18 = vpop.f32.mrb[7].mxu0  ;;  %1602 = vmatpush3.bf16.msra.mxu1 %v1599_v2  ;;  %v965_v12 = vmul.f32 %v1497_v20, %v1497_v20 }
 0x138   : > { %v942_v6 = vadd.f32 %v941_v21, %v744_v18  ;;  %v964_v9 = vmul.f32 %v744_v18, %v744_v18  ;;  %v978_v11 = vadd.f32 %v977_v19, %v963_v3  ;;  %v1603_v22 = vpack.c.bf16 %v1497_v20, %v744_v18  ;;  %v999_v19 = vld [vmem:[%s2355_s4 + $0x8] sm:$0xff]  ;;  %v1000_v18 = vld [vmem:[%s2355_s4 + $0x10] sm:$0xff] }
 0x13a   : > { %v979_v31 = vadd.f32 %v978_v11, %v964_v9  ;;  %v1500_v14 = vpop.f32.mrb[8].mxu0  ;;  %1604 = vmatprep.subr.bf16.mxu1 %v1603_v22  ;;  %v943_v23 = vadd.f32 %v1497_v20, %v942_v6  ;;  %v1001_v11 = vld [vmem:[%s2355_s4 + $0x18] sm:$0xff] }
 0x13b   : > { %v754_v24 = vpop.f32.mrb[9].mxu0  ;;  %1606 = vmatpush3.bf16.msra.mxu1 %v1603_v22  ;;  %v967_v33 = vmul.f32 %v1500_v14, %v1500_v14 }
 0x13c   : > { %v944_v29 = vadd.f32 %v943_v23, %v754_v24  ;;  %v966_v30 = vmul.f32 %v754_v24, %v754_v24  ;;  %v980_v13 = vadd.f32 %v979_v31, %v965_v12  ;;  %v1607_v32 = vpack.c.bf16 %v1500_v14, %v754_v24 }
 0x13e   : > { %v981_v34 = vadd.f32 %v980_v13, %v966_v30  ;;  %v1503_v36 = vpop.f32.mrb[10].mxu0  ;;  %1608 = vmatprep.subr.bf16.mxu1 %v1607_v32  ;;  %v945_v26 = vadd.f32 %v1500_v14, %v944_v29 }
 0x13f   : > { %v764_v38 = vpop.f32.mrb[11].mxu0  ;;  %1610 = vmatpush3.bf16.msra.mxu1 %v1607_v32  ;;  %v969_v43 = vmul.f32 %v1503_v36, %v1503_v36 }
 0x140   : > { %v946_v39 = vadd.f32 %v945_v26, %v764_v38  ;;  %v968_v40 = vmul.f32 %v764_v38, %v764_v38  ;;  %v982_v41 = vadd.f32 %v981_v34, %v967_v33  ;;  %v1611_v42 = vpack.c.bf16 %v1503_v36, %v764_v38  ;;  %v1115_v34 = vld [vmem:[%s2357_s6] sm:$0xff]  ;;  %v1019_v26 = vpop.permute.xlu1 %1018 }
 0x142   : > { %v983_v44 = vadd.f32 %v982_v41, %v968_v40  ;;  %v1506_v45 = vpop.f32.mrb[12].mxu0  ;;  %1612 = vmatprep.subr.bf16.mxu1 %v1611_v42  ;;  %v947_v48 = vadd.f32 %v1503_v36, %v946_v39  ;;  %v1009_v36 = vpop.permute.xlu0 %1008 }
 0x143   : > { %v774_v16 = vpop.f32.mrb[13].mxu0  ;;  %1614 = vmatpush3.bf16.msra.mxu1 %v1611_v42  ;;  %v971_v54 = vmul.f32 %v1506_v45, %v1506_v45 }
 0x144   : > { %v948_v49 = vadd.f32 %v947_v48, %v774_v16  ;;  %v970_v50 = vmul.f32 %v774_v16, %v774_v16  ;;  %v984_v51 = vadd.f32 %v983_v44, %v969_v43  ;;  %v1615_v53 = vpack.c.bf16 %v1506_v45, %v774_v16  ;;  %v1024_v44 = vpop.permute.xlu1 %1023 }
 0x146   : > { %v985_v55 = vadd.f32 %v984_v51, %v970_v50  ;;  %v1509_v56 = vpop.f32.mrb[14].mxu0  ;;  %1616 = vmatprep.subr.bf16.mxu1 %v1615_v53  ;;  %v949_v58 = vadd.f32 %v1506_v45, %v948_v49  ;;  %v1014_v38 = vpop.permute.xlu0 %1013 }
 0x147   : > { %v784_v59 = vpop.f32.mrb[15].mxu0  ;;  %1618 = vmatpush3.bf16.msra.mxu1 %v1615_v53  ;;  %v973_v63 = vmul.f32 %v1509_v56, %v1509_v56 }
 0x148   : > { %v950_v5 = vadd.f32 %v949_v58, %v784_v59  ;;  %v972_v60 = vmul.f32 %v784_v59, %v784_v59  ;;  %v986_v61 = vadd.f32 %v985_v55, %v971_v54  ;;  %v1619_v62 = vpack.c.bf16 %v1509_v56, %v784_v59  ;;  %v817_v59 = vpop.permute.xlu1 %816 }
 0x14a   : > { %v951_v2 = vadd.f32 %v1509_v56, %v950_v5  ;;  %v987_v3 = vadd.f32 %v986_v61, %v972_v60  ;;  %1620 = vmatprep.subr.bf16.mxu1 %v1619_v62  ;;  %v1116_v56 = vld [vmem:[%s2357_s6 + $0x8] sm:$0xff]  ;;  %v812_v58 = vpop.permute.xlu0 %811  ;;  %v890_v5 = vmul.f32 %v817_v59, %v1961_v47 }
 0x14b   : > { %1622 = vmatpush3.bf16.msra.mxu1 %v1619_v62  ;;  %v889_v60 = vmul.f32 %v812_v58, %v1959_v46 }
 0x14c   : > { %v952_v20 = vrot.slane %v951_v2, 4  ;;  %v988_v21 = vadd.f32 %v987_v3, %v973_v63 }
 0x14d   : > { %v905_v62 = vadd.f32 %v890_v5, %v889_v60 }
 0x14e   : > { %v953_v6 = vadd.f32 %v952_v20, %v951_v2  ;;  %v989_v9 = vrot.slane %v988_v21, 4  ;;  %1543 = vmatmul.mubr.f32.vlgmr.msra.gmra.mrb[0].mxu1 %v999_v19  ;;  %v822_v61 = vpop.permute.xlu0 %821  ;;  %v827_v2 = vpop.permute.xlu1 %826 }
 0x14f   : > { %1545 = vmatprep.mubr.f32.mxu1 %v1000_v18  ;;  %v891_v63 = vmul.f32 %v822_v61, %v1996_v0  ;;  %v892_v3 = vmul.f32 %v827_v2, %v1998_v1 }
 0x150   : > { %v954_v22 = vrot.slane %v953_v6, 2  ;;  %v990_v12 = vadd.f32 %v989_v9, %v988_v21 }
 0x151   : > { %v906_v19 = vadd.f32 %v905_v62, %v891_v63 }
 0x152   : > { %v955_v31 = vadd.f32 %v954_v22, %v953_v6  ;;  %v991_v14 = vrot.slane %v990_v12, 2  ;;  %1546 = vmatmul.mubr.f32.gmra.mrb[2].mxu1 %v1001_v11  ;;  %v832_v20 = vpop.permute.xlu0 %831  ;;  %v837_v6 = vpop.permute.xlu1 %836 }
 0x153   : > { %1556 = vmatprep.mubr.msk.f32.mxu1 %vm1129_vm0, %v1115_v34  ;;  %v893_v21 = vmul.f32 %v832_v20, %v2030_v15  ;;  %v907_v18 = vadd.f32 %v906_v19, %v892_v3  ;;  %v894_v9 = vmul.f32 %v837_v6, %v2039_v35 }
 0x154   : > { %v956_v23 = vrot.slane %v955_v31, 1  ;;  %v992_v24 = vadd.f32 %v991_v14, %v990_v12 }
 0x155   : > { %v908_v11 = vadd.f32 %v907_v18, %v893_v21 }
 0x156   : > { %v957_v29 = vadd.f32 %v956_v23, %v955_v31  ;;  %v993_v30 = vrot.slane %v992_v24, 1  ;;  %v842_v22 = vpop.permute.xlu0 %841  ;;  %v847_v12 = vpop.permute.xlu1 %846 }
 0x157   : > { %v895_v47 = vmul.f32 %v842_v22, %v2070_v17  ;;  %v909_v46 = vadd.f32 %v908_v11, %v894_v9  ;;  %v896_v31 = vmul.f32 %v847_v12, %v2077_v52 }
 0x158   : > { %v2269_v13 = vadd.f32 %v993_v30, %v992_v24  ;;  %v2271_v32 = vmul.f32 %v957_v29, %v957_v29 }
 0x159   : > { %v910_v0 = vadd.f32 %v909_v46, %v895_v47 }
 0x15a   : > { %v996_v33 = vsub.f32 %v2271_v32, %v2269_v13  ;;  %v852_v14 = vpop.permute.xlu0 %851  ;;  %v857_v24 = vpop.permute.xlu1 %856 }
 0x15b   : > { %v897_v1 = vmul.f32 %v852_v14, %v2112_v25  ;;  %v911_v23 = vadd.f32 %v910_v0, %v896_v31  ;;  %v898_v15 = vmul.f32 %v857_v24, %v2114_v4 }
 0x15c   : > { %v997_v9 = vmul.f32 0.5, %v996_v33 }
 0x15d   : > { %v912_v29 = vadd.f32 %v911_v23, %v897_v1 }
 0x15e   : > { %v862_v30 = vpop.permute.xlu0 %861  ;;  %v867_v34 = vpop.permute.xlu1 %866 }
 0x15f   : > { %v899_v35 = vmul.f32 %v862_v30, %v2150_v27  ;;  %v900_v17 = vmul.f32 %v867_v34, %v2152_v37 }
 0x221   : > { %v1544_v39 = vpop.f32.mrb[0].mxu1 }
 0x222   : > { %v1098_v40 = vadd.f32 %v1544_v39, %v1014_v38  ;;  %v1092_v41 = vpop.f32.mrb[1].mxu1  ;;  %v877_v38 = vpop.permute.xlu1 %876 }
 0x223   : > { %v1093_v42 = vadd.f32 %v1092_v41, %v1009_v36  ;;  %v913_v36 = vadd.f32 %v912_v29, %v898_v15  ;;  %v872_v39 = vpop.permute.xlu0 %871  ;;  %v902_v25 = vmul.f32 %v877_v38, %v2183_v57 }
 0x224   : > { %v1112_v43 = vmax.f32 %v1098_v40, 0.0  ;;  %v901_v52 = vmul.f32 %v872_v39, %v2181_v28 }
 0x225   : > { %v1111_v45 = vmax.f32 %v1093_v42, 0.0  ;;  %v1547_v48 = vpop.f32.mrb[2].mxu1 }
 0x226   : > { %v1108_v16 = vadd.f32 %v1547_v48, %v1024_v44  ;;  %v1102_v49 = vpop.f32.mrb[3].mxu1  ;;  %v1122_v41 = vpop.permute.xlu1 %1121 }
 0x227   : > { %v1623_v50 = vpack.c.bf16 %v1112_v43, %v1111_v45  ;;  %v1103_v51 = vadd.f32 %v1102_v49, %v1019_v26  ;;  %v914_v26 = vadd.f32 %v913_v36, %v899_v35  ;;  %v882_v43 = vpop.permute.xlu0 %881 }
 0x228   : > { %v1114_v53 = vmax.f32 %v1108_v16, 0.0  ;;  %v903_v4 = vmul.f32 %v882_v43, %v2203_v8 }
 0x229   : > { %v1113_v54 = vmax.f32 %v1103_v51, 0.0  ;;  %1624 = vmatprep.subr.bf16.mxu1 %v1623_v50  ;;  %v915_v40 = vadd.f32 %v914_v26, %v900_v17 }
 0x22a   : > { %1626 = vmatpush3.bf16.msra.mxu1 %v1623_v50  ;;  %v887_v45 = vpop.permute.xlu1 %886 }
 0x22b   : > { %v1627_v55 = vpack.c.bf16 %v1114_v53, %v1113_v54  ;;  %v916_v42 = vadd.f32 %v915_v40, %v901_v52  ;;  %v904_v27 = vmul.f32 %v887_v45, %v2205_v10  ;;  %v1127_v50 = vpop.permute.xlu0 %1126 }
 0x22d   : > { %1628 = vmatprep.subr.bf16.mxu1 %v1627_v55  ;;  %v917_v44 = vadd.f32 %v916_v42, %v902_v25 }
 0x22e   : > { %1630 = vmatpush3.bf16.msra.mxu1 %v1627_v55  ;;  %v1223_v57 = vpop.permute.xlu1 %1222 }
 0x22f   : > { %v918_v48 = vadd.f32 %v917_v44, %v903_v4  ;;  %v1218_v59 = vpop.permute.xlu0 %1217 }
 0x231   : > { %1557 = vmatmul.mubr.msk.f32.vlgmr.msra.gmra.mrb[4].mxu1 %vm1129_vm0, %v1116_v56  ;;  %v919_v16 = vadd.f32 %v918_v48, %v904_v27 }
 0x232   : > { %v1238_v18 = vpop.permute.xlu1 %1237 }
 0x233   : > { %v920_v37 = vrot.slane %v919_v16, 4  ;;  %v930_v10 = vpop.permute.xlu0 %929  ;;  %v1243_v22 = vrot.slane %v1238_v18, %v1863_v7 }
 0x234   : > { %v935_v19 = vrot.slane %v930_v10, %v1863_v7 }
 0x235   : > { %v921_v49 = vadd.f32 %v920_v37, %v919_v16 }
 0x237   : > { %v922_v54 = vrot.slane %v921_v49, 2 }
 0x239   : > { %v923_v8 = vadd.f32 %v922_v54, %v921_v49 }
 0x23b   : > { %v924_v62 = vrot.slane %v923_v8, 1 }
 0x23d   : > { %v925_v3 = vadd.f32 %v924_v62, %v923_v8 }
 0x23f   : > { %v936_v6 = vadd.f32 %v935_v19, %v925_v3 }
 0x241   : > { %v1245_v46 = vadd.f32 %v997_v9, %v936_v6 }
 0x304   : > { %v1558_v51 = vpop.f32.mrb[4].mxu1 }
 0x305   : > { %v1208_v53 = vadd.f32 %v1558_v51, %v1127_v50  ;;  %v1202_v28 = vpop.f32.mrb[5].mxu1 }
 0x306   : > { %v1203_v55 = vadd.f32 %v1202_v28, %v1122_v41 }
 0x307   : > { %v1212_v56 = vmax.f32 %v1208_v53, 0.0 }
 0x308   : > { %v1211_v58 = vmax.f32 %v1203_v55, 0.0 }
 0x309   : > { %v1226_v5 = vmul.f32 %v1223_v57, %v1212_v56 }
 0x30a   : > { %v1225_v60 = vmul.f32 %v1218_v59, %v1211_v58 }
 0x30c   : > { %v1227_v61 = vadd.f32 %v1226_v5, %v1225_v60 }
 0x30e   : > { %v1228_v63 = vrot.slane %v1227_v61, 4 }
 0x310   : > { %v1229_v2 = vadd.f32 %v1228_v63, %v1227_v61 }
 0x312   : > { %v1230_v20 = vrot.slane %v1229_v2, 2 }
 0x314   : > { %v1231_v21 = vadd.f32 %v1230_v20, %v1229_v2 }
 0x316   : > { %v1232_v11 = vrot.slane %v1231_v21, 1 }
 0x318   : > { %v1233_v47 = vadd.f32 %v1232_v11, %v1231_v21 }
 0x31a   : > { %v1244_v12 = vadd.f32 %v1243_v22, %v1233_v47 }
 0x31c   : > { %v1246_v31 = vadd.f32 %v1245_v46, %v1244_v12 }
 0x31e   : > { %v1247_v0 = vsub.f32 0.0, %v1246_v31 }
 0x320   : > { %v1248_v14 = vmul.f32 1.442695, %v1247_v0 }
 0x322   : > { %1674 = vpow2.f32 %v1248_v14 }
 0x32c   : > { %v1675_v1 = vpop.eup %1674 }
 0x32d   : > { %v1250_v23 = vadd.f32 1.0, %v1675_v1 }
 0x32f   : > { %1676 = vrcp.f32 %v1250_v23 }
 0x339   : > { %v1677_v7 = vpop.eup %1676 }
 0x33a   : > { %1253 = vst [vmem:[%s353_s15] sm:$0x1] %v1677_v7 }
 0x33b   : > { %1691 = shalt.err (!%p1688_p3)
}
 0x33c   : > { %s1692_s11 = scalar_lea.hbm %s2309_s23, 16  ;;  %s1696_s14 = scalar_lea.hbm %s2360_s10, 32 }
 0x33d   : > { %p1693_p4 = scmp.ne.s32.totalorder %s2309_s23, %s1692_s11  ;;  %p1697_p9 = scmp.lt.u32.totalorder %s2309_s23, %s2360_s10 }
 0x33e   : > { %p1698_p10 = scmp.lt.u32.totalorder %s1696_s14, %s1692_s11  ;;  %p1700_p12 = scmp.lt.u32.totalorder %s1692_s11, %s2309_s23 }
 0x33f   : > { %p1694_p7 = pnand %p1693_p4, %p1844_p5 }
 0x340   : > { %p1699_p11 = por %p1698_p10, %p1697_p9 }
 0x341   : > { %p1695_p8 = pneg %p1694_p7 }
 0x342   : > { %p1701_p13 = por %p1700_p12, %p1699_p11 }
 0x344   : > { %p1702_p0 = pnand %p1701_p13, %p1695_p8 }
 0x346   : > { %1705 = shalt.err (!%p1702_p0)
}
 0x347   : > { %1631 = dma.vmem_to_hbm [thread:$0]  (%p1844_p5), %s2311_s16, 16, %s2309_s23, %s1255_s27  }
 0x348 PF: > { %p1637_p1 = scmp.ge.s32.totalorder %s1740_s20, 2  ;;  %s1279_s22 = sand.u32 1, %s1728_s17  }
 0x349   : > { %s1280_s28 = scalar_lea.sflag [#allocation5], %s1279_s22 }
 0x34a   : > { %p1634_p2 = pnand %p1637_p1, %p1848_p6 }
 0x34c   : > { %1723 = dma.done.wait (!%p1634_p2), %s1280_s28, 16  }
 0x34d   : > { %1725 = vsyncadd (!%p1634_p2), %s1280_s28, 4294967280  ;;  %p24_p3 = scmp.ge.s32.totalorder %s1831_s21, 4   ;;  %s2364_s17 = smov %s1732_s18 }
 0x34e   : > { %s2365_s18 = smov %s1736_s19  ;;  %s2366_s19 = smov %s1842_s24 }
 0x34f   : > { %s2367_s20 = smov %s1831_s21  ;;  %26 = sbr.rel (!%p24_p3) target bundleno = 6 (0x6), region = 95 }
 0x356   :  { %1284 = vsyncpa [#allocation5], 1 }
 0x357   :  { %1286 = vsyncpa [#allocation5 + $0x1], 1 }

</bundles_post_ra>
